<compile_context>
chip_gen: v7x
topology: tpu7x:2x2x1
jax: 0.10.0
libtpu: 0.0.40
codegen_flags: <defaults>
</compile_context>

<pallas_src>
import functools

import jax
import jax.numpy as jnp
from jax.experimental import pallas as pl
from jax.experimental.pallas import tpu as pltpu


# ---------------------------------------------------------------------------
# Tiling configuration.
# Worst-case resident footprint at these caps (double-buffered):
#   x (512,1024) bf16 x2 = 2 MiB, w (1024,512) bf16 x2 = 2 MiB,
#   out (512,512) f32 x2 = 2 MiB, acc scratch 1 MiB            -> ~7 MiB,
# well inside the 32 MiB scoped limit requested below and inside v7x's
# 64 MiB physical VMEM.
# ---------------------------------------------------------------------------
_TM_MAX = 512
_TN_MAX = 512
_TK_MAX = 1024
_VMEM_LIMIT = 32 * 1024 * 1024


def _round_up(x, m):
    return ((x + m - 1) // m) * m


def _pick_block(dim, cap, align):
    """Pick a block size <= cap.

    - dim <= cap: use the full extent (always layout-legal, single block).
    - otherwise prefer the largest `align`-aligned divisor of dim; if none
      exists, fall back to `cap` and let the caller zero-pad dim up to a
      multiple (keeps VMEM bounded -- no silent 'block == huge full dim').
    """
    if dim <= cap:
        return dim
    b = (cap // align) * align
    while b >= align:
        if dim % b == 0:
            return b
        b -= align
    return cap


# ----------------------------------------------------------------------------
# One-time weight fake-quant ('max' init, per-tensor), emitted as bf16.
# min/max is a one-time XLA reduce over the HBM-resident weight; the quantize
# apply is a tiled Pallas kernel (no whole-tensor VMEM residency -> v7x-safe).
# ----------------------------------------------------------------------------
def _wq_apply_kernel(w_ref, q_ref, o_ref, *, qmax):
    delta = q_ref[0]
    zp = q_ref[1]
    inv_delta = q_ref[2]                   # precomputed 1/delta (no VALU divide)
    w = w_ref[...]
    q = jnp.clip(jnp.round(w * inv_delta) + zp, 0.0, qmax)
    o_ref[...] = ((q - zp) * delta).astype(o_ref.dtype)


def fake_quant_weight_bf16(w2d, n_bits=8):
    qmax = float(2 ** n_bits - 1)
    w2d = w2d.astype(jnp.float32)
    wmin = jnp.minimum(jnp.min(w2d), 0.0)
    wmax = jnp.maximum(jnp.max(w2d), 0.0)
    delta = jnp.maximum((wmax - wmin) / qmax, 1e-8)
    zp = jnp.round(-wmin / delta)
    qparams = jnp.stack([delta, zp, 1.0 / delta]).astype(jnp.float32)

    R, C = w2d.shape
    tr = _pick_block(R, 512, 16)
    tc = _pick_block(C, 512, 128)
    Rp, Cp = _round_up(R, tr), _round_up(C, tc)
    wp = w2d if (Rp == R and Cp == C) else jnp.pad(w2d, ((0, Rp - R), (0, Cp - C)))

    out = pl.pallas_call(
        functools.partial(_wq_apply_kernel, qmax=qmax),
        out_shape=jax.ShapeDtypeStruct((Rp, Cp), jnp.bfloat16),
        grid=(Rp // tr, Cp // tc),
        in_specs=[
            pl.BlockSpec((tr, tc), lambda i, j: (i, j)),
            pl.BlockSpec(memory_space=pltpu.MemorySpace.SMEM),   # [delta, zp, 1/delta]
        ],
        out_specs=pl.BlockSpec((tr, tc), lambda i, j: (i, j)),
        compiler_params=pltpu.CompilerParams(
            dimension_semantics=("parallel", "parallel"),
            vmem_limit_bytes=_VMEM_LIMIT),
    )(wp, qparams)
    return out if (Rp == R and Cp == C) else out[:R, :C]


# ----------------------------------------------------------------------------
# Tiled matmul + bias + (optional) fused frozen activation fake-quant.
# bf16 MXU operands, f32 VMEM accumulator, K is the last ("arbitrary") axis.
# ----------------------------------------------------------------------------
def _qmm_kernel(*refs, act, qmax):
    if act:
        x_ref, w_ref, b_ref, q_ref, o_ref, acc_ref = refs
    else:
        x_ref, w_ref, b_ref, o_ref, acc_ref = refs

    k = pl.program_id(2)

    @pl.when(k == 0)
    def _():
        acc_ref[...] = jnp.zeros_like(acc_ref)

    acc_ref[...] += jnp.dot(x_ref[...], w_ref[...],
                            preferred_element_type=jnp.float32)

    @pl.when(k == pl.num_programs(2) - 1)
    def _():
        out = acc_ref[...] + b_ref[...]
        if act:   # frozen per-tensor activation quantizer (delta/zp from SMEM)
            delta = q_ref[0]
            zp = q_ref[1]
            inv_delta = q_ref[2]
            q = jnp.clip(jnp.round(out * inv_delta) + zp, 0.0, qmax)
            out = (q - zp) * delta
        o_ref[...] = out.astype(o_ref.dtype)


def quant_matmul(x, w_bf16, b_row, act_qparams, *, n_bits=8):
    """QuantModule Linear forward: x(M,K) @ w(K,N) + b, fused frozen act quant.

    act_qparams: (3,) f32 [delta, zp, 1/delta] or None (quantizer disabled).
    Ragged dims are zero-padded (exact for K; padded M/N rows are sliced off).
    """
    M, K = x.shape
    Kw, N = w_bf16.shape
    assert K == Kw
    qmax = float(2 ** n_bits - 1)
    xb = x.astype(jnp.bfloat16)

    tm = _pick_block(M, _TM_MAX, 16)      # 16: bf16 packs 2 rows per sublane
    tn = _pick_block(N, _TN_MAX, 128)
    tk = _pick_block(K, _TK_MAX, 128)
    Mp, Kp, Np = _round_up(M, tm), _round_up(K, tk), _round_up(N, tn)
    if (Mp, Kp) != (M, K):
        xb = jnp.pad(xb, ((0, Mp - M), (0, Kp - K)))
    wb = w_bf16 if (Kp, Np) == (K, N) else jnp.pad(w_bf16, ((0, Kp - K), (0, Np - N)))
    bb = b_row if Np == N else jnp.pad(b_row, ((0, 0), (0, Np - N)))

    act = act_qparams is not None
    in_specs = [
        pl.BlockSpec((tm, tk), lambda i, j, k: (i, k)),
        pl.BlockSpec((tk, tn), lambda i, j, k: (k, j)),
        pl.BlockSpec((1, tn), lambda i, j, k: (0, j)),
    ]
    args = [xb, wb, bb]
    if act:
        in_specs.append(pl.BlockSpec(memory_space=pltpu.MemorySpace.SMEM))
        args.append(act_qparams)

    # TODO(synk): on v5e/v6e store the weight as int8 codes + (delta, zp) and
    # dequantize (or drive the int8 MXU) in-kernel to halve weight DMA bytes.
    out = pl.pallas_call(
        functools.partial(_qmm_kernel, act=act, qmax=qmax),
        out_shape=jax.ShapeDtypeStruct((Mp, Np), jnp.float32),
        grid=(Mp // tm, Np // tn, Kp // tk),
        in_specs=in_specs,
        out_specs=pl.BlockSpec((tm, tn), lambda i, j, k: (i, j)),
        scratch_shapes=[pltpu.VMEM((tm, tn), jnp.float32)],
        compiler_params=pltpu.CompilerParams(
            dimension_semantics=("parallel", "parallel", "arbitrary"),
            vmem_limit_bytes=_VMEM_LIMIT),
    )(*args)
    if (Mp, Np) != (M, N):
        out = out[:M, :N]
    return out


# ----------------------------------------------------------------------------
# im2col-free QuantModule Conv2d (stride 1): one padded NHWC image per grid
# step, kh*kw tap accumulation folded inside the kernel, fused bias + frozen
# activation fake-quant.  No kh*kw-times-larger activation slab ever touches
# HBM.
# ----------------------------------------------------------------------------
def _qconv_kernel(*refs, kh, kw, Ho, Wo, act, qmax):
    if act:
        x_ref, w_ref, b_ref, q_ref, o_ref = refs
    else:
        x_ref, w_ref, b_ref, o_ref = refs
    C = x_ref.shape[-1]
    OC = o_ref.shape[-1]

    acc = jnp.zeros((Ho, Wo, OC), jnp.float32)
    for i in range(kh):                         # static unroll over the taps
        for j in range(kw):
            patch = x_ref[0, i:i + Ho, j:j + Wo, :]               # (Ho,Wo,C) bf16
            w_tap = jnp.broadcast_to(w_ref[i * kw + j], (Ho, OC, C))
            acc = acc + jnp.einsum('hwc,hoc->hwo', patch, w_tap,
                                   preferred_element_type=jnp.float32)

    out = acc + b_ref[...]                      # (1,OC) broadcasts over (Ho,Wo,OC)
    if act:
        delta = q_ref[0]
        zp = q_ref[1]
        inv_delta = q_ref[2]
        q = jnp.clip(jnp.round(out * inv_delta) + zp, 0.0, qmax)
        out = (q - zp) * delta
    o_ref[...] = out[None].astype(o_ref.dtype)


def quant_conv2d_nhwc(x, w_taps_bf16, b_row, act_qparams, *, kh, kw, padding,
                      n_bits=8):
    """x: (B,H,W,C) NHWC.  w_taps_bf16: (kh*kw, OC, C) pre-fake-quantized bf16.

    TODO(synk): for production feature maps, tile H (halo'd row blocks) and OC
    (tn multiple of 128/256 for lane-dense stores) instead of one whole image
    per grid step; at the toy sizes one image per step maximizes the tile and
    keeps both v7x TensorCores busy via the batch axis.
    """
    B, H, W, C = x.shape
    KK, OC, Cw = w_taps_bf16.shape
    assert KK == kh * kw and Cw == C
    qmax = float(2 ** n_bits - 1)

    xb = x.astype(jnp.bfloat16)
    xp = jnp.pad(xb, ((0, 0), (padding, padding), (padding, padding), (0, 0)))
    Hp, Wp = H + 2 * padding, W + 2 * padding
    Ho, Wo = Hp - kh + 1, Wp - kw + 1

    act = act_qparams is not None
    in_specs = [
        pl.BlockSpec((1, Hp, Wp, C), lambda b: (b, 0, 0, 0)),
        pl.BlockSpec((KK, OC, C), lambda b: (0, 0, 0)),
        pl.BlockSpec((1, OC), lambda b: (0, 0)),
    ]
    args = [xp, w_taps_bf16, b_row]
    if act:
        in_specs.append(pl.BlockSpec(memory_space=pltpu.MemorySpace.SMEM))
        args.append(act_qparams)

    return pl.pallas_call(
        functools.partial(_qconv_kernel, kh=kh, kw=kw, Ho=Ho, Wo=Wo,
                          act=act, qmax=qmax),
        out_shape=jax.ShapeDtypeStruct((B, Ho, Wo, OC), jnp.float32),
        grid=(B,),
        in_specs=in_specs,
        out_specs=pl.BlockSpec((1, Ho, Wo, OC), lambda b: (b, 0, 0, 0)),
        compiler_params=pltpu.CompilerParams(
            dimension_semantics=("parallel",),     # batch across v7x's 2 TCs
            vmem_limit_bytes=_VMEM_LIMIT),
    )(*args)


# ----------------------------------------------------------------------------
# Model plumbing (synthetic stand-in for the injected LDM UNet).
# ----------------------------------------------------------------------------
def silu(x):
    return x * jax.nn.sigmoid(x)


def init_params(key):
    ks = jax.random.split(key, 10)

    def w(k, shape, fan_in):
        return jax.random.normal(k, shape, jnp.float32) / jnp.sqrt(float(fan_in))

    return {
        'time_w': w(ks[0], (32, 8), 8),        'time_b': w(ks[1], (32,), 8),
        'temb_w': w(ks[2], (8, 32), 32),       'temb_b': w(ks[3], (8,), 32),
        'ctx_w':  w(ks[4], (8, 16), 16),       'ctx_b':  w(ks[5], (8,), 16),
        'cin_w':  w(ks[6], (8, 4, 3, 3), 36),  'cin_b':  w(ks[7], (8,), 36),
        'cout_w': w(ks[8], (4, 8, 3, 3), 72),  'cout_b': w(ks[9], (4,), 72),
    }


def prepare_quant_weights(params, n_bits=8, weight_quant=True):
    """Reshape and (optionally) fake-quantize every QuantModule weight ONCE
    (weights are constant across forwards -> the weight_quantizer is hoisted
    out of the hot path).  Linear weights come out (in, out) bf16, conv
    weights per-tap (kh*kw, OC, IC) bf16, biases (1, N) f32."""
    def quant(w2d):
        return (fake_quant_weight_bf16(w2d, n_bits) if weight_quant
                else w2d.astype(jnp.bfloat16))

    def prep_linear(w, b):                     # w: (out, in) torch convention
        return {'w': quant(w.T), 'b': b.reshape(1, -1).astype(jnp.float32)}

    def prep_conv(w, b):                       # w: (OC, IC, kh, kw)
        OC, IC, kh, kw = w.shape
        w2d = w.transpose(2, 3, 0, 1).reshape(kh * kw * OC, IC)
        w_taps = quant(w2d).reshape(kh * kw, OC, IC)
        return {'w': w_taps, 'b': b.reshape(1, -1).astype(jnp.float32)}

    return {
        'time': prep_linear(params['time_w'], params['time_b']),
        'temb': prep_linear(params['temb_w'], params['temb_b']),
        'ctx':  prep_linear(params['ctx_w'],  params['ctx_b']),
        'cin':  prep_conv(params['cin_w'],  params['cin_b']),
        'cout': prep_conv(params['cout_w'], params['cout_b']),
    }


def _act_qparams_from(y, qmax):
    amin = jnp.minimum(jnp.min(y), 0.0)
    amax = jnp.maximum(jnp.max(y), 0.0)
    delta = jnp.maximum((amax - amin) / qmax, 1e-8)
    zp = jnp.round(-amin / delta)
    return jnp.stack([delta, zp, 1.0 / delta]).astype(jnp.float32)


def _fake_quant_with(y, qp, qmax):
    delta, zp, inv_delta = qp[0], qp[1], qp[2]
    return (jnp.clip(jnp.round(y * inv_delta) + zp, 0.0, qmax) - zp) * delta


def calibrate_act_quantizers(qw, image, t, context, n_bits=8):
    """One-time 'max' init of every QuantModule activation quantizer on a
    calibration batch (mirrors UniformAffineQuantizer.inited: params freeze
    after the first forward in BRECQ).  Pure-XLA reference forward, runs once
    and off the kernel hot path; the frozen (delta, zp, 1/delta) triples are
    then fused into the Pallas epilogues."""
    qmax = float(2 ** n_bits - 1)
    aq = {}

    def qlinear(name, xin, layer):
        y = xin @ layer['w'].astype(jnp.float32) + layer['b']
        aq[name] = _act_qparams_from(y, qmax)
        return _fake_quant_with(y, aq[name], qmax)

    def qconv(name, xin, layer, padding, act):
        w3 = layer['w'].astype(jnp.float32)                    # (kh*kw, OC, C)
        KK, OC, _ = w3.shape
        kh = kw = int(round(KK ** 0.5))
        B, H, W, _ = xin.shape
        xp = jnp.pad(xin, ((0, 0), (padding, padding), (padding, padding), (0, 0)))
        Ho, Wo = H + 2 * padding - kh + 1, W + 2 * padding - kw + 1
        y = jnp.zeros((B, Ho, Wo, OC), jnp.float32)
        for i in range(kh):
            for j in range(kw):
                y = y + jnp.einsum('bhwc,oc->bhwo',
                                   xp[:, i:i + Ho, j:j + Wo, :], w3[i * kw + j])
        y = y + layer['b'].reshape(1, 1, 1, -1)
        if act:
            aq[name] = _act_qparams_from(y, qmax)
            y = _fake_quant_with(y, aq[name], qmax)
        return y

    temb = silu(qlinear('time', t, qw['time']))
    temb = qlinear('temb', temb, qw['temb'])
    B, S, Dc = context.shape
    ctx = qlinear('ctx', context.reshape(B * S, Dc), qw['ctx']).reshape(B, S, -1).mean(axis=1)
    x = jnp.transpose(image, (0, 2, 3, 1))
    h = qconv('cin', x, qw['cin'], 1, True)
    h = silu(h + temb[:, None, None, :] + ctx[:, None, None, :])
    _ = qconv('cout', h, qw['cout'], 1, False)    # output layer: act quant disabled
    return aq


def quant_model_forward(qw, aq, image, t, context, act_quant=True, n_bits=8):
    """QuantModel.forward(image, t, context) over the synthetic wrapped model.
    Every Conv2d/Linear is a QuantModule; the last conv's activation quantizer
    is disabled, mimicking disable_network_output_quantization()."""
    # TODO(synk): the real QuantModel wraps an arbitrary injected LDM UNet;
    # this fixed 2-conv/3-linear graph stands in for it.
    def qp(name):
        return aq[name] if act_quant else None

    # timestep-embedding MLP (tiny M -> single-tile pallas_calls; launch
    # overhead dominates regardless, kept in Pallas for uniformity)
    temb = quant_matmul(t, qw['time']['w'], qw['time']['b'], qp('time'),
                        n_bits=n_bits)                                   # (B,32)
    temb = silu(temb)
    temb = quant_matmul(temb, qw['temb']['w'], qw['temb']['b'], qp('temb'),
                        n_bits=n_bits)                                   # (B,8)

    # context projection (per token) + mean pool over the sequence
    B, S, Dc = context.shape
    ctx = quant_matmul(context.reshape(B * S, Dc), qw['ctx']['w'],
                       qw['ctx']['b'], qp('ctx'), n_bits=n_bits)
    ctx = ctx.reshape(B, S, -1).mean(axis=1)                             # (B,8)

    # conv path, NHWC end-to-end, im2col-free
    x = jnp.transpose(image, (0, 2, 3, 1))                               # NCHW->NHWC
    h = quant_conv2d_nhwc(x, qw['cin']['w'], qw['cin']['b'], qp('cin'),
                          kh=3, kw=3, padding=1, n_bits=n_bits)
    h = silu(h + temb[:, None, None, :] + ctx[:, None, None, :])
    out = quant_conv2d_nhwc(h, qw['cout']['w'], qw['cout']['b'], None,   # last layer:
                            kh=3, kw=3, padding=1, n_bits=n_bits)        # act quant off
    return jnp.transpose(out, (0, 3, 1, 2))                              # NHWC->NCHW


if __name__ == "__main__":
    key = jax.random.PRNGKey(0)
    k_img, k_t, k_ctx = jax.random.split(key, 3)
    image = jax.random.normal(k_img, (2, 4, 16, 16), jnp.float32)        # NCHW
    t = jax.random.normal(k_t, (2, 8), jnp.float32)
    context = jax.random.normal(k_ctx, (2, 8, 16), jnp.float32)

    params = init_params(jax.random.PRNGKey(42))

    # mimics QuantModel.set_quant_state(weight_quant=True, act_quant=True):
    # weight fake-quant runs once here (weights never change between forwards).
    qweights = prepare_quant_weights(params, n_bits=8, weight_quant=True)

    # one-time 'max' init of the activation quantizers (frozen thereafter,
    # as in BRECQ after the first calibration batch).
    act_qparams = jax.jit(calibrate_act_quantizers)(qweights, image, t, context)
    jax.block_until_ready(act_qparams)

    fwd = jax.jit(quant_model_forward, static_argnames=("act_quant", "n_bits"))
    out = fwd(qweights, act_qparams, image, t, context, act_quant=True, n_bits=8)
    jax.block_until_ready(out)

    assert out.shape == (2, 4, 16, 16) and out.dtype == jnp.float32
    assert bool(jnp.all(jnp.isfinite(out)))
    print("KERNEL_OK")
</pallas_src>

<mosaic_0001>
module attributes {stable_mosaic.version = 11 : i64} {
  func.func @_wq_apply_kernel(%arg0: i32, %arg1: i32, %arg2: memref<8x32xf32, #tpu.memory_space<vmem>>, %arg3: memref<3xf32, #tpu.memory_space<smem>>, %arg4: memref<8x32xbf16, #tpu.memory_space<vmem>>) attributes {dimension_semantics = [#tpu.dimension_semantics<parallel>, #tpu.dimension_semantics<parallel>], iteration_bounds = array<i64: 1, 1>, scalar_prefetch = 0 : i64, scratch_operands = 0 : i64, tpu.core_type = #tpu.core_type<tc>, window_params = [{transform_indices = @transform_0, window_bounds = array<i64: 8, 32>}, {transform_indices = @transform_1, window_bounds = array<i64: 3>}, {transform_indices = @transform_2, window_bounds = array<i64: 8, 32>}]} {
    %c0 = arith.constant 0 : index
    %0 = memref.load %arg3[%c0] : memref<3xf32, #tpu.memory_space<smem>>
    %c1 = arith.constant 1 : index
    %1 = memref.load %arg3[%c1] : memref<3xf32, #tpu.memory_space<smem>>
    %c2 = arith.constant 2 : index
    %2 = memref.load %arg3[%c2] : memref<3xf32, #tpu.memory_space<smem>>
    %c0_0 = arith.constant 0 : index
    %c0_1 = arith.constant 0 : index
    %3 = vector.load %arg2[%c0_0, %c0_1] : memref<8x32xf32, #tpu.memory_space<vmem>>, vector<8x32xf32>
    %4 = vector.broadcast %2 : f32 to vector<8x32xf32>
    %5 = arith.mulf %3, %4 : vector<8x32xf32>
    %6 = math.roundeven %5 : vector<8x32xf32>
    %7 = vector.broadcast %1 : f32 to vector<8x32xf32>
    %8 = arith.addf %6, %7 : vector<8x32xf32>
    %cst = arith.constant 0.000000e+00 : f32
    %cst_2 = arith.constant 2.550000e+02 : f32
    %9 = vector.broadcast %cst : f32 to vector<8x32xf32>
    %10 = arith.maximumf %9, %8 : vector<8x32xf32>
    %11 = vector.broadcast %cst_2 : f32 to vector<8x32xf32>
    %12 = arith.minimumf %11, %10 : vector<8x32xf32>
    %13 = vector.broadcast %1 : f32 to vector<8x32xf32>
    %14 = arith.subf %12, %13 : vector<8x32xf32>
    %15 = vector.broadcast %0 : f32 to vector<8x32xf32>
    %16 = arith.mulf %14, %15 : vector<8x32xf32>
    %17 = arith.truncf %16 : vector<8x32xf32> to vector<8x32xbf16>
    %c0_3 = arith.constant 0 : index
    %c0_4 = arith.constant 0 : index
    %18 = vector.load %arg4[%c0_3, %c0_4] : memref<8x32xbf16, #tpu.memory_space<vmem>>, vector<8x32xbf16>
    tpu.vector_store %arg4[%c0_3, %c0_4], %17 {strides = array<i32>} : memref<8x32xbf16, #tpu.memory_space<vmem>>, vector<8x32xbf16>,
    return
  }
  func.func @transform_0(%arg0: i32, %arg1: i32) -> (i32, i32) {
    %c0_i32 = arith.constant 0 : i32
    return %arg0, %arg1 : i32, i32
  }
  func.func @transform_1(%arg0: i32, %arg1: i32) -> i32 {
    %c0_i32 = arith.constant 0 : i32
    %c0_i32_0 = arith.constant 0 : i32
    return %c0_i32 : i32
  }
  func.func @transform_2(%arg0: i32, %arg1: i32) -> (i32, i32) {
    %c0_i32 = arith.constant 0 : i32
    return %arg0, %arg1 : i32, i32
  }
}

</mosaic_0001>

<bundles_post_ra>
// kernel: tpu_custom_call.1
= control target key start
LH: loop header
LB: loop body
LE: loop exit
PB: predicated region body
PF: predicated region fallthrough
CT: control target
= control target key end

     0   :  { %7 = vsyncpa [#allocation3], 0  ;;  %s183_s0 = inlined_call_operand.hbm [shape: f32[8,32], index: 0, kind: input, shape index: {}]   ;;  %s184_s1 = inlined_call_operand.vmem [shape: f32[3], index: 1, kind: input, shape index: {}]   ;;  %s185_s2 = inlined_call_operand.hbm [shape: bf16[8,32], index: 2, kind: output, shape index: {}]  }
   0x1   :  { %8 = vsyncpa [#allocation5], 0 }
   0x2   :  { %9 = vsyncpa [#allocation4], 0  ;;  %s26_s11 = sshll.u32 %s184_s1, 4  ;;  %s138_s12 = smov [#allocation2]   ;;  %s27_s11 = int_to_ptr.vmem [resolvable:$true] %s26_s11 }
   0x3   :  { %s16_s13 = sshll.u32 %s138_s12, 4  ;;  %s76_s16 = scalar_lea.hbm %s183_s0, 128  ;;  %s17_s13 = int_to_ptr.vmem [resolvable:$true] %s16_s13 }
   0x4   :  { %p77_p0 = scmp.ne.s32.totalorder %s183_s0, %s76_s16  ;;  %p80_p1 = scmp.lt.u32.totalorder %s76_s16, %s183_s0 }
   0x6   :  { %p82_p2 = pnand %p80_p1, %p77_p0 }
   0x8   :  { %85 = shalt.err (!%p82_p2)
}
   0x9   :  { %s86_s21 = scalar_lea.vmem %s17_s13, 128  ;;  %p91_p4 = scmp.lt.s32.totalorder %s17_s13, %s17_s13 }
   0xa   :  { %p87_p3 = scmp.ne.s32.totalorder %s17_s13, %s86_s21  ;;  %p92_p5 = scmp.lt.s32.totalorder %s86_s21, %s86_s21 }
   0xc   :  { %p93_p6 = por %p92_p5, %p91_p4 }
   0xe   :  { %p94_p7 = pnand %p93_p6, %p87_p3 }
  0x10   :  { %97 = shalt.err (!%p94_p7)
}
  0x11   :  { %19 = dma.hbm_to_vmem [thread:$0]  %s183_s0, 128, %s17_s13, [#allocation3]  }
  0x12   :  { %s98_s23 = scalar_lea.vmem %s27_s11, 16  ;;  %p103_p9 = scmp.lt.s32.totalorder %s27_s11, %s27_s11 }
  0x13   :  { %p99_p8 = scmp.ne.s32.totalorder %s27_s11, %s98_s23  ;;  %p104_p10 = scmp.lt.s32.totalorder %s98_s23, %s98_s23 }
  0x15   :  { %p105_p11 = por %p104_p10, %p103_p9 }
  0x17   :  { %p106_p12 = pnand %p105_p11, %p99_p8 }
  0x19   :  { %109 = shalt.err (!%p106_p12)
}
  0x1a   :  { %s139_s24 = smov [#allocation6]  }
  0x1b   :  { %29 = dma.vmem_to_smem %s27_s11, 16, %s139_s24, [#allocation5]  }
  0x1c   :  { %132 = dma.done.wait [#allocation3], 128  }
  0x1d   :  { %133 = vsyncadd [#allocation3], 4294967168 }
  0x1e   :  { %134 = dma.done.wait [#allocation5], 16  }
  0x1f   :  { %135 = vsyncadd [#allocation5], 4294967280 }
  0x20   :  { %36 = sfence }
  0x21   :  { %s70_s25 = sld [smem:[#allocation6 + $0x1]]  ;;  %s71_s26 = sld [smem:[#allocation6 + $0x2]]  ;;  %v40_v0 = vld [vmem:[#allocation2] sm:$0xff]  ;;  %vm52_vm0 = vcmask 257024  }
  0x22   :  { %s37_s0 = sld [smem:[#allocation6]]  ;;  %s140_s27 = smov [#allocation7]  }
  0x23   :  { %s60_s28 = sshll.u32 %s140_s27, 4  ;;  %s61_s28 = int_to_ptr.vmem [resolvable:$true] %s60_s28 }
  0x24   :  { %s110_s29 = scalar_lea.vmem %s61_s28, 64  ;;  %p115_p0 = scmp.lt.s32.totalorder %s61_s28, %s61_s28 }
  0x25   :  { %p111_p13 = scmp.ne.s32.totalorder %s61_s28, %s110_s29  ;;  %p116_p1 = scmp.lt.s32.totalorder %s110_s29, %s110_s29 }
  0x27   :  { %v41_v1 = vstv %s71_s26  ;;  %v44_v3 = vstv %s70_s25  ;;  %p117_p2 = por %p116_p1, %p115_p0 }
  0x28   :  { %v42_v2 = vmul.f32 %v41_v1, %v40_v0  ;;  %v49_v8 = vstv %s37_s0 }
  0x29   :  { %p118_p3 = pnand %p117_p2, %p111_p13 }
  0x2a   :  { %v72_v4 = vround.rtne.f32 %v42_v2 }
  0x2c   :  { %v45_v5 = vadd.f32 %v72_v4, %v44_v3 }
  0x2e   :  { %v46_v6 = vmax.f32 %v45_v5, 0.0 }
  0x30   :  { %v47_v7 = vmin.f32 %v46_v6, 255.0 }
  0x32   :  { %v48_v9 = vsub.f32 %v47_v7, %v44_v3 }
  0x34   :  { %v50_v10 = vmul.f32 %v49_v8, %v48_v9 }
  0x36   :  { %v51_v11 = vpack.c.bf16 %v50_v10, %v50_v10 }
  0x38   :  { %53 = vst.msk [vmem:[#allocation7] sm:$0xf] %vm52_vm0, %v51_v11 }
  0x39   :  { %121 = shalt.err (!%p118_p3)
}
  0x3a   :  { %s122_s4 = scalar_lea.hbm %s185_s2, 64 }
  0x3b   :  { %p123_p4 = scmp.ne.s32.totalorder %s185_s2, %s122_s4  ;;  %p126_p5 = scmp.lt.u32.totalorder %s122_s4, %s185_s2 }
  0x3d   :  { %p128_p6 = pnand %p126_p5, %p123_p4 }
  0x3f   :  { %131 = shalt.err (!%p128_p6)
}
  0x40   :  { %63 = dma.vmem_to_hbm [thread:$0]  %s61_s28, 64, %s185_s2, [#allocation4]  }
  0x41   :  { %136 = dma.done.wait [#allocation4], 64  }
  0x42   :  { %137 = vsyncadd [#allocation4], 4294967232 }
  0x43   :  { %67 = vsyncpa [#allocation3], 1 }
  0x44   :  { %68 = vsyncpa [#allocation4], 1 }
  0x45   :  { %69 = vsyncpa [#allocation5], 1 }

</bundles_post_ra>
